<compile_context>
chip_gen: v5e
topology: v5e:2x2
jax: 0.10.0
libtpu: 0.0.40
codegen_flags: <defaults>
</compile_context>

<pallas_src>
import functools
import math

import jax
import jax.numpy as jnp
from jax.experimental import pallas as pl
from jax.experimental.pallas import tpu as pltpu


_LANES = 128
_TILE_TARGET_BYTES = 4 * 1024 * 1024   # per-buffer tile target (~4 MiB)
_VMEM_LIMIT_BYTES = 32 * 1024 * 1024   # 4 double-buffered tiles + headroom


def _drop_path_kernel(inv_keep_prob, keep_ref, x_ref, o_ref):
    """One grid step handles a (1, TR, 128) tile of sample b.

    keep_ref: (B,) int32 in SMEM (scalar prefetch); 0 = drop sample, 1 = keep.
    """
    b = pl.program_id(0)
    keep_b = keep_ref[b]

    @pl.when(keep_b != 0)
    def _():
        # Cast the scalar scale into the input dtype so bf16 inputs stay bf16
        # on the VPU (no f32 promotion of the whole tile).
        scale = jnp.asarray(inv_keep_prob, dtype=x_ref.dtype)
        o_ref[...] = (x_ref[...] * scale).astype(o_ref.dtype)

    @pl.when(keep_b == 0)
    def _():
        # Dropped sample: write zeros without reading x_ref.  Combined with
        # the pinned input index_map this elides the per-tile read DMA.
        o_ref[...] = jnp.zeros_like(o_ref)


def _choose_row_tile(rows, row_bytes, batch):
    """Rows per tile: multiple of 8 (sublane) under ~4 MiB, or the full extent.

    The grid uses pl.cdiv, so the tile does NOT have to divide `rows`; the
    ragged last block is masked by Pallas.
    """
    max_rows = max(8, _TILE_TARGET_BYTES // max(row_bytes, 1))
    if rows <= max_rows:
        tr = rows                      # block dim == full array dim: legal
    else:
        tr = (max_rows // 8) * 8       # multiple of 8; ragged tail via cdiv
    # v7x has 2 TensorCores: make sure small inputs still produce >= 2 grid
    # steps so both cores get work.
    if batch == 1 and pl.cdiv(rows, tr) == 1 and rows >= 16:
        tr = ((rows + 1) // 2 + 7) // 8 * 8
    return tr


@functools.partial(jax.jit, static_argnames=("drop_prob",))
def _drop_path_train(x, key, drop_prob):
    keep_prob = 1.0 - drop_prob
    orig_shape = x.shape
    B = x.shape[0]
    L = math.prod(x.shape[1:])

    # Per-sample drop decision (matches torch: floor(keep_prob + U[0,1))).
    u = jax.random.uniform(key, (B,), dtype=jnp.float32)
    keep = jnp.floor(jnp.float32(keep_prob) + u).astype(jnp.int32)   # (B,)

    # Lane-dense view: fold all non-batch dims into (R, 128).  If L is not a
    # multiple of 128, pad so stores stay full unmasked 128-lane vectors and
    # we never fall back to a whole-sample block.
    pad = (-L) % _LANES
    if pad:
        xr = jnp.pad(x.reshape(B, L), ((0, 0), (0, pad)))
    else:
        xr = x.reshape(B, L)
    Lp = L + pad
    R = Lp // _LANES
    xr = xr.reshape(B, R, _LANES)

    itemsize = jnp.dtype(x.dtype).itemsize
    tr = _choose_row_tile(R, _LANES * itemsize, B)
    grid = (B, pl.cdiv(R, tr))

    kernel = functools.partial(_drop_path_kernel, float(1.0 / keep_prob))
    out = pl.pallas_call(
        kernel,
        out_shape=jax.ShapeDtypeStruct((B, R, _LANES), x.dtype),
        grid_spec=pltpu.PrefetchScalarGridSpec(
            num_scalar_prefetch=1,
            grid=grid,
            # Dropped samples pin the input row-block to 0 (r * keep[b]) so
            # consecutive grid steps reuse the same block and Pallas skips the
            # repeated read DMA for that sample.
            in_specs=[pl.BlockSpec((1, tr, _LANES),
                                   lambda b, r, keep: (b, r * keep[b], 0))],
            out_specs=pl.BlockSpec((1, tr, _LANES),
                                   lambda b, r, keep: (b, r, 0)),
        ),
        compiler_params=pltpu.CompilerParams(
            dimension_semantics=("parallel", "parallel"),
            vmem_limit_bytes=_VMEM_LIMIT_BYTES),
    )(keep, xr)

    out = out.reshape(B, Lp)
    if pad:
        out = out[:, :L]
    return out.reshape(orig_shape)


def drop_path(x, drop_prob: float = 0.0, training: bool = False, *, key=None):
    """Pallas implementation of per-sample stochastic depth (DropPath)."""
    if drop_prob == 0.0 or not training:
        return x
    if key is None:
        key = jax.random.PRNGKey(0)
    return _drop_path_train(x, key, float(drop_prob))


class DropPath:
    """Drop paths (Stochastic Depth) per sample."""

    def __init__(self, drop_prob=None):
        self.drop_prob = drop_prob if drop_prob is not None else 0.0
        self.training = True   # mirror nn.Module.train() default for the demo

    def __call__(self, x, *, key=None):
        return drop_path(x, self.drop_prob, self.training, key=key)


if __name__ == "__main__":
    key = jax.random.PRNGKey(0)
    xkey, dkey = jax.random.split(key)
    B, N, D = 2, 8, 32
    x = jax.random.normal(xkey, (B, N, D), dtype=jnp.float32)

    # Training path with nonzero drop prob -> runs the Pallas kernel.
    mod = DropPath(drop_prob=0.5)
    y = jax.block_until_ready(mod(x, key=dkey))

    # Sanity: each sample must be either all-zero or exactly x / keep_prob.
    keep_prob = 0.5
    for b in range(B):
        slab = y[b]
        is_zero = bool(jnp.allclose(slab, 0.0))
        is_scaled = bool(jnp.allclose(slab, x[b] / keep_prob, atol=1e-5))
        assert is_zero or is_scaled, "DropPath sample is neither dropped nor scaled"

    # Eval path (training=False) must be identity.
    mod.training = False
    y_eval = jax.block_until_ready(mod(x))
    assert bool(jnp.allclose(y_eval, x))

    print("KERNEL_OK")
</pallas_src>

<mosaic_0001>
module attributes {stable_mosaic.version = 11 : i64} {
  func.func @_drop_path_kernel(%arg0: i32, %arg1: i32, %arg2: memref<2xi32, #tpu.memory_space<smem>>, %arg3: memref<1x2x128xf32, #tpu.memory_space<vmem>>, %arg4: memref<1x2x128xf32, #tpu.memory_space<vmem>>) attributes {dimension_semantics = [#tpu.dimension_semantics<parallel>, #tpu.dimension_semantics<parallel>], iteration_bounds = array<i64: 2, 1>, scalar_prefetch = 1 : i64, scratch_operands = 0 : i64, tpu.core_type = #tpu.core_type<tc>, window_params = [{transform_indices = @transform_0, window_bounds = array<i64: 1, 2, 128>}, {transform_indices = @transform_1, window_bounds = array<i64: 1, 2, 128>}]} {
    %0 = arith.index_cast %arg0 : i32 to index
    %1 = memref.load %arg2[%0] : memref<2xi32, #tpu.memory_space<smem>>
    %c0_i32 = arith.constant 0 : i32
    %2 = arith.cmpi ne, %1, %c0_i32 : i32
    %3 = arith.extui %2 : i1 to i32
    %c0_i32_0 = arith.constant 0 : i32
    %4 = arith.cmpi ne, %3, %c0_i32_0 : i32
    scf.if %4 {
      %c0 = arith.constant 0 : index
      %c0_3 = arith.constant 0 : index
      %c0_4 = arith.constant 0 : index
      %8 = vector.load %arg3[%c0, %c0_3, %c0_4] : memref<1x2x128xf32, #tpu.memory_space<vmem>>, vector<1x2x128xf32>
      %cst = arith.constant 2.000000e+00 : f32
      %9 = vector.broadcast %cst : f32 to vector<1x2x128xf32>
      %10 = arith.mulf %8, %9 : vector<1x2x128xf32>
      %c0_5 = arith.constant 0 : index
      %c0_6 = arith.constant 0 : index
      %c0_7 = arith.constant 0 : index
      %11 = vector.load %arg4[%c0_5, %c0_6, %c0_7] : memref<1x2x128xf32, #tpu.memory_space<vmem>>, vector<1x2x128xf32>
      tpu.vector_store %arg4[%c0_5, %c0_6, %c0_7], %10 {strides = array<i32>} : memref<1x2x128xf32, #tpu.memory_space<vmem>>, vector<1x2x128xf32>,
    } else {
    }
    %c0_i32_1 = arith.constant 0 : i32
    %5 = arith.cmpi eq, %1, %c0_i32_1 : i32
    %6 = arith.extui %5 : i1 to i32
    %c0_i32_2 = arith.constant 0 : i32
    %7 = arith.cmpi ne, %6, %c0_i32_2 : i32
    scf.if %7 {
      %cst = arith.constant 0.000000e+00 : f32
      %8 = vector.broadcast %cst : f32 to vector<1x2x128xf32>
      %c0 = arith.constant 0 : index
      %c0_3 = arith.constant 0 : index
      %c0_4 = arith.constant 0 : index
      %9 = vector.load %arg4[%c0, %c0_3, %c0_4] : memref<1x2x128xf32, #tpu.memory_space<vmem>>, vector<1x2x128xf32>
      tpu.vector_store %arg4[%c0, %c0_3, %c0_4], %8 {strides = array<i32>} : memref<1x2x128xf32, #tpu.memory_space<vmem>>, vector<1x2x128xf32>,
    } else {
    }
    return
  }
  func.func @transform_0(%arg0: i32, %arg1: i32, %arg2: memref<2xi32, #tpu.memory_space<smem>>) -> (i32, i32, i32) {
    %0 = arith.index_cast %arg0 : i32 to index
    %1 = memref.load %arg2[%0] : memref<2xi32, #tpu.memory_space<smem>>
    %2 = arith.muli %arg1, %1 : i32
    %c0_i32 = arith.constant 0 : i32
    %c0_i32_0 = arith.constant 0 : i32
    return %arg0, %2, %c0_i32 : i32, i32, i32
  }
  func.func @transform_1(%arg0: i32, %arg1: i32, %arg2: memref<2xi32, #tpu.memory_space<smem>>) -> (i32, i32, i32) {
    %c0_i32 = arith.constant 0 : i32
    %c0_i32_0 = arith.constant 0 : i32
    return %arg0, %arg1, %c0_i32 : i32, i32, i32
  }
}

</mosaic_0001>

<bundles_post_ra>
// kernel: _drop_path_train.1
= control target key start
LH: loop header
LB: loop body
LE: loop exit
PB: predicated region body
PF: predicated region fallthrough
CT: control target
= control target key end

     0   :  { %s328_s12 = smov [#allocation3]   ;;  %s374_s0 = inlined_call_operand.vmem [shape: s32[2], index: 0, kind: input, shape index: {}]   ;;  %s375_s1 = inlined_call_operand.vmem [shape: f32[2,2,128], index: 1, kind: input, shape index: {}]   ;;  %s376_s2 = inlined_call_operand.vmem [shape: f32[2,2,128], index: 2, kind: output, shape index: {}]  }
   0x1   :  { %s8_s11 = sshll.u32 %s374_s0, 4  ;;  %s9_s11 = int_to_ptr.vmem [resolvable:$true] %s8_s11 }
   0x2   :  { %11 = dma.vmem_to_smem %s9_s11, 16, %s328_s12, [#allocation2] }
   0x3   :  { %314 = dma.done.wait [#allocation2], 16 }
   0x4   :  { %315 = vsyncadd [#allocation2], 4294967280 }
   0x5   :  { %14 = sfence }
   0x6   :  { %s348_s13 = smov 0   ;;  %s350_s14 = smov 0  }
   0x7   :  { %s352_s15 = smov 0  }
   0x8 LB: > { %s32_s0 = sadd.s32 1, %s322_s14  ;;  %p257_p0 = scmp.ge.s32.totalorder %s326_s15, 1  ;;  %s326_s15 = sphi %s352_s15, %s20_s15   ;;  %s322_s14 = sphi %s350_s14, %s378_s14   ;;  %s318_s13 = sphi %s348_s13, %s377_s13  }
   0x9   : > { %p34_p1 = scmp.ge.s32.totalorder %s32_s0, 2  ;;  %p122_p2 = scmp.lt.s32.totalorder %s326_s15, 3 }
   0xb   : > { %s380_s0 = smov (%p34_p1, %s32_s0), 0  ;;  %p123_p3 = pnand %p257_p0, %p122_p2 }
   0xc   : > { %p150_p4 = scmp.lt.s32.totalorder (!%p123_p3), %s318_s13, 1  ;;  %s166_s16 = sld [smem:[#allocation3 + %s318_s13]] (!%p123_p3) }
   0xd   : > { %126 = sbr.rel (%p123_p3) target bundleno = 39 (0x27), region = 24 }
  0x12   : > { %s382_s13 = smov (!%p150_p4, %s318_s13), 1  ;;  %p260_p5 = scmp.eq.s32.totalorder %s166_s16, 0 }
  0x13   : > { %s258_s17 = sshll.u32 %s382_s13, 1 }
  0x14   : > { %s156_s20 = scalar_lea.vmem %s375_s1, %s258_s17  ;;  %s165_s23 = scalar_lea.vmem %s376_s2, %s258_s17 }
  0x15   : > { %170 = sbr.rel (%p260_p5) target bundleno = 30 (0x1e), region = 28 }
  0x1a   : > { %v171_v0 = vld [vmem:[%s156_s20] sm:$0x3] }
  0x1b   : > { %v172_v1 = vmul.f32 2.0, %v171_v0 }
  0x1d   : > { %173 = vst [vmem:[%s165_s23] sm:$0x3] %v172_v1 }
  0x1e PF: > { %p261_p6 = scmp.ne.s32.totalorder %s166_s16, 0 }
  0x20   : > { %177 = sbr.rel (%p261_p6) target bundleno = 39 (0x27), region = 32 }
  0x25   : > { %v329_v2 = vmov 0.0  }
  0x26   : > { %178 = vst [vmem:[%s165_s23] sm:$0x3] %v329_v2 }
  0x27 PF: > { %s20_s15 = sadd.s32 1, %s326_s15   ;;  %s377_s13 = smov %s322_s14 }
  0x28   : > { %p17_p7 = scmp.ge.s32.totalorder %s20_s15, 4   ;;  %s378_s14 = smov %s380_s0 }
  0x2a   :  { %19 = sbr.rel (!%p17_p7) target bundleno = 8 (0x8), region = 62 }

</bundles_post_ra>
